<compile_context>
chip_gen: v7x
topology: tpu7x:2x2x1
jax: 0.10.0
libtpu: 0.0.40
codegen_flags: <defaults>
</compile_context>

<pallas_src>
import functools

import numpy as np

import jax
import jax.numpy as jnp
from jax.experimental import pallas as pl
from jax.experimental.pallas import tpu as pltpu


def _fused_decode_kernel(
    # ---- constant inputs (resident in VMEM for the whole decode) ----------
    x0_ref, h0_ref,            # (1,E) SOS embedding, (1,H) initial hidden (f32)
    emb_ref,                   # (S,A)   encoder embeddings            (bf16)
    table_ref,                 # (V,E)   vocab embedding table         (bf16)
    wih_ref, whh_ref,          # (E,3H), (H,3H) GRU weights (pre-T)    (bf16)
    bih_ref, bhh_ref,          # (1,3H)  GRU biases                    (f32)
    attn_pre_ref,              # (A+1,S) (emb @ Wa_emb)^T, loop-invariant (f32)
    wap_ref,                   # (A+1,1) coverage column of Wa^T       (f32)
    waq_ref,                   # (H,A+1) query rows of Wa              (bf16)
    ba_ref,                    # (1,A+1) attention bias                (f32)
    va_ref,                    # (1,A+1) scoring vector v^T            (f32)
    wouth_ref, woutc_ref,      # (H,V), (A,V) output projection (pre-split, bf16)
    bout_ref,                  # (1,V)                                 (f32)
    # ---- per-step outputs ---------------------------------------------------
    words_ref,                 # (1,1,1) int32  sampled word id
    attw_ref,                  # (1,1,S) f32    attention row (lane-major)
    # ---- recurrent state (persists across grid steps) ------------------------
    x_sc, h_sc, past_sc,       # (1,E), (1,H), (1,S)  VMEM scratch
    *, hid_dim):
    t = pl.program_id(0)
    H = hid_dim
    f32, bf16 = jnp.float32, jnp.bfloat16

    @pl.when(t == 0)
    def _init():
        x_sc[...] = x0_ref[...]
        h_sc[...] = h0_ref[...]
        past_sc[...] = jnp.zeros_like(past_sc)      # initContext()

    x = x_sc[...]                  # (1, E) current word embedding
    h = h_sc[...]                  # (1, H) GRU hidden
    past = past_sc[...]            # (1, S) coverage (lane-major)

    # ---------------- GRU cell (PyTorch gate order r, z, n) -----------------
    gi = jnp.dot(x.astype(bf16), wih_ref[...], preferred_element_type=f32) + bih_ref[...]
    gh = jnp.dot(h.astype(bf16), whh_ref[...], preferred_element_type=f32) + bhh_ref[...]
    r = jax.nn.sigmoid(gi[:, 0:H] + gh[:, 0:H])
    z = jax.nn.sigmoid(gi[:, H:2 * H] + gh[:, H:2 * H])
    n = jnp.tanh(gi[:, 2 * H:3 * H] + r * gh[:, 2 * H:3 * H])   # b_hn stays inside r*(.)
    h_new = (1.0 - z) * n + z * h                                # (1, H)

    # -------- concat (Bahdanau) attention over [emb ; past_attn] ------------
    # Lane-major formulation:  pre^T (A+1, S) =
    #   (emb @ Wa_e)^T  [precomputed, loop-invariant]
    # + Wa_p^T * past   [outer broadcast, past is a (1,S) row]
    # + (h_new @ Wa_q + ba)^T [per-step query column]
    q = jnp.dot(h_new.astype(bf16), waq_ref[...], preferred_element_type=f32) + ba_ref[...]  # (1, A+1)
    A1 = q.shape[1]
    # Row -> column flip of q done with broadcasts + a lane reduce (avoids an
    # unsupported (1,N)->(N,1) relayout/transpose inside the kernel).
    eye = (jax.lax.broadcasted_iota(jnp.int32, (A1, A1), 0)
           == jax.lax.broadcasted_iota(jnp.int32, (A1, A1), 1)).astype(f32)
    q_col = jnp.sum(eye * q, axis=1, keepdims=True)              # (A+1, 1) == q^T
    pre_t = attn_pre_ref[...] + wap_ref[...] * past + q_col      # (A+1, S)
    score = jnp.dot(va_ref[...], jnp.tanh(pre_t), preferred_element_type=f32)  # (1, S)

    m = jnp.max(score, axis=1, keepdims=True)
    e = jnp.exp(score - m)
    attn = e * pl.reciprocal(jnp.sum(e, axis=1, keepdims=True), approx=True)   # (1, S)
    # context[:, :, :-1] in the reference drops the coverage column, so only
    # the encoder embeddings contribute to the context.
    context = jnp.dot(attn.astype(bf16), emb_ref[...], preferred_element_type=f32)  # (1, A)

    # -------------- output projection + greedy word selection ---------------
    logits = (jnp.dot(h_new.astype(bf16), wouth_ref[...], preferred_element_type=f32)
              + jnp.dot(context.astype(bf16), woutc_ref[...], preferred_element_type=f32)
              + bout_ref[...])                                                  # (1, V)
    # argmax(softmax(logits / temp)) == argmax(logits) for temp > 0, so the
    # temperature softmax of computeProba() is skipped for greedy sampling.
    V = logits.shape[1]
    lane = jax.lax.broadcasted_iota(jnp.int32, logits.shape, 1)
    lmax = jnp.max(logits, axis=1, keepdims=True)
    widx = jnp.min(jnp.where(logits == lmax, lane, V), axis=1, keepdims=True)   # (1,1) int32
    onehot = jnp.where(lane == widx, 1.0, 0.0).astype(bf16)                     # (1, V)
    x_next = jnp.dot(onehot, table_ref[...], preferred_element_type=f32)        # (1, E) next embedding

    # ---------------- per-step outputs + state update ------------------------
    words_ref[0] = widx
    attw_ref[0] = attn
    x_sc[...] = x_next
    h_sc[...] = h_new
    past_sc[...] = past + attn          # past_attn += attn (coverage update)


def _pack_params(params, embeddings, hidden, sos_token):
    """Host/XLA-side preprocessing: split / transpose / cast weights once."""
    f32, bf16 = jnp.float32, jnp.bfloat16
    emb = embeddings[0].astype(f32)                    # (S, A)
    A = emb.shape[1]
    H = params["W_hh_T"].shape[0]
    w_a = params["W_a"].astype(f32)                    # rows: [emb(A) | past(1) | query(H)]
    wa_e, wa_p, wa_q = w_a[:A], w_a[A:A + 1], w_a[A + 1:]
    w_out = params["W_out_T"].astype(f32)              # rows: [hidden(H) | context(A)]
    return (
        params["embedding"][sos_token][None, :].astype(f32),   # x0  (1, E) = SOS embedding
        hidden[-1].astype(f32),                                  # h0  (1, H)
        emb.astype(bf16),                                        # emb (S, A)
        params["embedding"].astype(bf16),                        # table (V, E)
        params["W_ih_T"].astype(bf16),                           # (E, 3H)
        params["W_hh_T"].astype(bf16),                           # (H, 3H)
        params["b_ih"].astype(f32),                              # (1, 3H)
        params["b_hh"].astype(f32),                              # (1, 3H)
        jnp.dot(emb, wa_e).T.astype(f32),                        # attn_pre (A+1, S), loop-invariant
        wa_p.T.astype(f32),                                      # (A+1, 1)
        wa_q.astype(bf16),                                       # (H, A+1)
        params["b_a"].astype(f32),                               # (1, A+1)
        params["v_a"].T.astype(f32),                             # (1, A+1)
        w_out[:H].astype(bf16),                                  # (H, V)
        w_out[H:].astype(bf16),                                  # (A, V)
        params["b_out"].astype(f32),                             # (1, V)
    )


@functools.partial(jax.jit, static_argnames=("bound", "sos_token"))
def fused_greedy_decode(hidden, embeddings, params, *, bound, sos_token):
    """All `bound` greedy decode steps in a single pallas_call.

    Returns (words (bound,) int32, attn_rows (bound, S) f32).
    """
    S = embeddings.shape[1]
    H = hidden.shape[-1]
    E = params["embedding"].shape[1]
    args = _pack_params(params, embeddings, hidden, sos_token)

    kernel = functools.partial(_fused_decode_kernel, hid_dim=H)
    # Every weight/input uses a whole-array block with a constant block index,
    # so it is DMA'd to VMEM once and stays resident across all decode steps.
    in_specs = [pl.BlockSpec(a.shape, lambda t: (0, 0)) for a in args]
    out_shapes = (jax.ShapeDtypeStruct((bound, 1, 1), jnp.int32),
                  jax.ShapeDtypeStruct((bound, 1, S), jnp.float32))
    out_specs = (pl.BlockSpec((1, 1, 1), lambda t: (t, 0, 0)),
                 pl.BlockSpec((1, 1, S), lambda t: (t, 0, 0)))
    # TODO(synk): at realistic vocab sizes, tile W_out over V (grid axis +
    # online argmax) and gather embedding rows from HBM via make_async_copy;
    # whole-array VMEM residency is only valid for small demo shapes.

    words, attw = pl.pallas_call(
        kernel,
        grid=(bound,),
        out_shape=out_shapes,
        in_specs=in_specs,
        out_specs=out_specs,
        scratch_shapes=[pltpu.VMEM((1, E), jnp.float32),   # current word embedding
                        pltpu.VMEM((1, H), jnp.float32),   # GRU hidden
                        pltpu.VMEM((1, S), jnp.float32)],  # coverage (past_attn)
        compiler_params=pltpu.CompilerParams(
            dimension_semantics=("arbitrary",)),
    )(*args)
    return words.reshape(bound), attw.reshape(bound, S)


def cov_attn_decoder_forward(hidden, embeddings, params, *, bound=25,
                             n_layer=1, temperature=1.0,
                             sos_token=1, eos_token=2):
    """Mirrors CovAttnDecoder.forward (greedy decode with coverage attention).

    hidden:     (num_layers, 1, hid_dim)
    embeddings: (1, seq_len, attn_dim)
    returns (answer: list[int], weights: (1, T, seq_len) or None)
    """
    del temperature  # top=None greedy argmax is invariant to temperature / softmax.
    # TODO(synk): n_layer > 1 stacked-GRU decoding is not implemented (the
    # reference path exercised here is the default n_layer=1).
    hidden = hidden[-n_layer:]
    words, attw = fused_greedy_decode(hidden, embeddings, params,
                                      bound=bound, sos_token=sos_token)
    words = np.asarray(jax.device_get(words))
    attw = np.asarray(jax.device_get(attw))

    # Host-side truncation at the first EOS (the data-dependent `break`).
    answer = []
    for t in range(bound):
        w = int(words[t])
        if w == eos_token:
            break
        answer.append(w)
    if answer:
        weights = jnp.asarray(attw[:len(answer)])[None, :, :]    # (1, T, S)
    else:
        weights = None
    return answer, weights


def init_params(key, vocab, emb_dim, attn_dim, hid_dim):
    """Deterministic synthetic parameters (shapes follow the module __init__)."""
    ks = jax.random.split(key, 10)
    s = 0.1
    f32 = jnp.float32
    return {
        # word2vec embedding table: (n_words, out_dim)
        "embedding": s * jax.random.normal(ks[0], (vocab, emb_dim), f32),
        # GRU (n_layer=1), stored pre-transposed as (in, 3H) for lane-major matmul
        "W_ih_T": s * jax.random.normal(ks[1], (emb_dim, 3 * hid_dim), f32),
        "W_hh_T": s * jax.random.normal(ks[2], (hid_dim, 3 * hid_dim), f32),
        "b_ih": s * jax.random.normal(ks[3], (1, 3 * hid_dim), f32),
        "b_hh": s * jax.random.normal(ks[4], (1, 3 * hid_dim), f32),
        # concat attention: Linear(emb_dim(=A+1) + query_dim(=H) -> A+1), v: (A+1 -> 1)
        "W_a": s * jax.random.normal(ks[5], (attn_dim + 1 + hid_dim, attn_dim + 1), f32),
        "b_a": s * jax.random.normal(ks[6], (1, attn_dim + 1), f32),
        "v_a": s * jax.random.normal(ks[7], (attn_dim + 1, 1), f32),
        # output: Linear(hid_dim + attn_dim -> n_words), stored pre-transposed
        "W_out_T": s * jax.random.normal(ks[8], (hid_dim + attn_dim, vocab), f32),
        "b_out": s * jax.random.normal(ks[9], (1, vocab), f32),
    }


if __name__ == "__main__":
    key = jax.random.PRNGKey(0)
    V, E, A, H, S = 64, 32, 16, 32, 8     # vocab, word2vec.out_dim, attn_dim, hid_dim, seq_len
    kp, kh, ke = jax.random.split(key, 3)

    params = init_params(kp, V, E, A, H)
    hidden = 0.1 * jax.random.normal(kh, (1, 1, H), jnp.float32)       # (n_layer, batch=1, H)
    embeddings = 0.1 * jax.random.normal(ke, (1, S, A), jnp.float32)   # (batch=1, S, attn_dim)

    bound = 6
    # Run the fused decode kernel once and block on its outputs.
    words, attw = fused_greedy_decode(hidden, embeddings, params,
                                      bound=bound, sos_token=1)
    jax.block_until_ready((words, attw))

    # Full greedy forward (single kernel launch + host-side EOS truncation).
    answer, weights = cov_attn_decoder_forward(hidden, embeddings, params,
                                               bound=bound, temperature=1.0)
    if weights is not None:
        jax.block_until_ready(weights)

    print("KERNEL_OK")
</pallas_src>

<mosaic_0001>
module attributes {stable_mosaic.version = 11 : i64} {
  func.func @_fused_decode_kernel(%arg0: i32, %arg1: memref<1x32xf32, #tpu.memory_space<vmem>>, %arg2: memref<1x32xf32, #tpu.memory_space<vmem>>, %arg3: memref<8x16xbf16, #tpu.memory_space<vmem>>, %arg4: memref<64x32xbf16, #tpu.memory_space<vmem>>, %arg5: memref<32x96xbf16, #tpu.memory_space<vmem>>, %arg6: memref<32x96xbf16, #tpu.memory_space<vmem>>, %arg7: memref<1x96xf32, #tpu.memory_space<vmem>>, %arg8: memref<1x96xf32, #tpu.memory_space<vmem>>, %arg9: memref<17x8xf32, #tpu.memory_space<vmem>>, %arg10: memref<17x1xf32, #tpu.memory_space<vmem>>, %arg11: memref<32x17xbf16, #tpu.memory_space<vmem>>, %arg12: memref<1x17xf32, #tpu.memory_space<vmem>>, %arg13: memref<1x17xf32, #tpu.memory_space<vmem>>, %arg14: memref<32x64xbf16, #tpu.memory_space<vmem>>, %arg15: memref<16x64xbf16, #tpu.memory_space<vmem>>, %arg16: memref<1x64xf32, #tpu.memory_space<vmem>>, %arg17: memref<1x1x1xi32, #tpu.memory_space<vmem>>, %arg18: memref<1x1x8xf32, #tpu.memory_space<vmem>>, %arg19: memref<1x32xf32, #tpu.memory_space<vmem>>, %arg20: memref<1x32xf32, #tpu.memory_space<vmem>>, %arg21: memref<1x8xf32, #tpu.memory_space<vmem>>) attributes {dimension_semantics = [#tpu.dimension_semantics<arbitrary>], iteration_bounds = array<i64: 6>, scalar_prefetch = 0 : i64, scratch_operands = 3 : i64, tpu.core_type = #tpu.core_type<tc>, window_params = [{pipeline_mode = #tpu.pipeline_mode<synchronous>, transform_indices = @transform_0, window_bounds = array<i64: 1, 32>}, {pipeline_mode = #tpu.pipeline_mode<synchronous>, transform_indices = @transform_1, window_bounds = array<i64: 1, 32>}, {pipeline_mode = #tpu.pipeline_mode<synchronous>, transform_indices = @transform_2, window_bounds = array<i64: 8, 16>}, {pipeline_mode = #tpu.pipeline_mode<synchronous>, transform_indices = @transform_3, window_bounds = array<i64: 64, 32>}, {pipeline_mode = #tpu.pipeline_mode<synchronous>, transform_indices = @transform_4, window_bounds = array<i64: 32, 96>}, {pipeline_mode = #tpu.pipeline_mode<synchronous>, transform_indices = @transform_5, window_bounds = array<i64: 32, 96>}, {pipeline_mode = #tpu.pipeline_mode<synchronous>, transform_indices = @transform_6, window_bounds = array<i64: 1, 96>}, {pipeline_mode = #tpu.pipeline_mode<synchronous>, transform_indices = @transform_7, window_bounds = array<i64: 1, 96>}, {pipeline_mode = #tpu.pipeline_mode<synchronous>, transform_indices = @transform_8, window_bounds = array<i64: 17, 8>}, {pipeline_mode = #tpu.pipeline_mode<synchronous>, transform_indices = @transform_9, window_bounds = array<i64: 17, 1>}, {pipeline_mode = #tpu.pipeline_mode<synchronous>, transform_indices = @transform_10, window_bounds = array<i64: 32, 17>}, {pipeline_mode = #tpu.pipeline_mode<synchronous>, transform_indices = @transform_11, window_bounds = array<i64: 1, 17>}, {pipeline_mode = #tpu.pipeline_mode<synchronous>, transform_indices = @transform_12, window_bounds = array<i64: 1, 17>}, {pipeline_mode = #tpu.pipeline_mode<synchronous>, transform_indices = @transform_13, window_bounds = array<i64: 32, 64>}, {pipeline_mode = #tpu.pipeline_mode<synchronous>, transform_indices = @transform_14, window_bounds = array<i64: 16, 64>}, {pipeline_mode = #tpu.pipeline_mode<synchronous>, transform_indices = @transform_15, window_bounds = array<i64: 1, 64>}, {transform_indices = @transform_16, window_bounds = array<i64: 1, 1, 1>}, {transform_indices = @transform_17, window_bounds = array<i64: 1, 1, 8>}]} {
    %c0_i32 = arith.constant 0 : i32
    %0 = arith.cmpi eq, %arg0, %c0_i32 : i32
    %1 = arith.extui %0 : i1 to i32
    %c0_i32_0 = arith.constant 0 : i32
    %2 = arith.cmpi ne, %1, %c0_i32_0 : i32
    scf.if %2 {
      %c0_63 = arith.constant 0 : index
      %c0_64 = arith.constant 0 : index
      %116 = vector.load %arg1[%c0_63, %c0_64] : memref<1x32xf32, #tpu.memory_space<vmem>>, vector<1x32xf32>
      %c0_65 = arith.constant 0 : index
      %c0_66 = arith.constant 0 : index
      %117 = vector.load %arg19[%c0_65, %c0_66] : memref<1x32xf32, #tpu.memory_space<vmem>>, vector<1x32xf32>
      tpu.vector_store %arg19[%c0_65, %c0_66], %116 {strides = array<i32>} : memref<1x32xf32, #tpu.memory_space<vmem>>, vector<1x32xf32>,
      %c0_67 = arith.constant 0 : index
      %c0_68 = arith.constant 0 : index
      %118 = vector.load %arg2[%c0_67, %c0_68] : memref<1x32xf32, #tpu.memory_space<vmem>>, vector<1x32xf32>
      %c0_69 = arith.constant 0 : index
      %c0_70 = arith.constant 0 : index
      %119 = vector.load %arg20[%c0_69, %c0_70] : memref<1x32xf32, #tpu.memory_space<vmem>>, vector<1x32xf32>
      tpu.vector_store %arg20[%c0_69, %c0_70], %118 {strides = array<i32>} : memref<1x32xf32, #tpu.memory_space<vmem>>, vector<1x32xf32>,
      %cst_71 = arith.constant 0.000000e+00 : f32
      %120 = vector.broadcast %cst_71 : f32 to vector<1x8xf32>
      %c0_72 = arith.constant 0 : index
      %c0_73 = arith.constant 0 : index
      %121 = vector.load %arg21[%c0_72, %c0_73] : memref<1x8xf32, #tpu.memory_space<vmem>>, vector<1x8xf32>
      tpu.vector_store %arg21[%c0_72, %c0_73], %120 {strides = array<i32>} : memref<1x8xf32, #tpu.memory_space<vmem>>, vector<1x8xf32>,
    } else {
    }
    %c0 = arith.constant 0 : index
    %c0_1 = arith.constant 0 : index
    %3 = vector.load %arg19[%c0, %c0_1] : memref<1x32xf32, #tpu.memory_space<vmem>>, vector<1x32xf32>
    %c0_2 = arith.constant 0 : index
    %c0_3 = arith.constant 0 : index
    %4 = vector.load %arg20[%c0_2, %c0_3] : memref<1x32xf32, #tpu.memory_space<vmem>>, vector<1x32xf32>
    %c0_4 = arith.constant 0 : index
    %c0_5 = arith.constant 0 : index
    %5 = vector.load %arg21[%c0_4, %c0_5] : memref<1x8xf32, #tpu.memory_space<vmem>>, vector<1x8xf32>
    %6 = arith.truncf %3 : vector<1x32xf32> to vector<1x32xbf16>
    %c0_6 = arith.constant 0 : index
    %c0_7 = arith.constant 0 : index
    %7 = vector.load %arg5[%c0_6, %c0_7] : memref<32x96xbf16, #tpu.memory_space<vmem>>, vector<32x96xbf16>
    %cst = arith.constant dense<0.000000e+00> : vector<1x96xf32>
    %8 = tpu.matmul %6, %7, %cst {dimension_numbers = #tpu.dot_dimension_numbers<[1], [0], [0], [1], [0, 0, 1, 1], [], []>} : vector<1x32xbf16>, vector<32x96xbf16>, vector<1x96xf32> -> vector<1x96xf32>
    %c0_8 = arith.constant 0 : index
    %c0_9 = arith.constant 0 : index
    %9 = vector.load %arg7[%c0_8, %c0_9] : memref<1x96xf32, #tpu.memory_space<vmem>>, vector<1x96xf32>
    %10 = arith.addf %8, %9 : vector<1x96xf32>
    %11 = arith.truncf %4 : vector<1x32xf32> to vector<1x32xbf16>
    %c0_10 = arith.constant 0 : index
    %c0_11 = arith.constant 0 : index
    %12 = vector.load %arg6[%c0_10, %c0_11] : memref<32x96xbf16, #tpu.memory_space<vmem>>, vector<32x96xbf16>
    %cst_12 = arith.constant dense<0.000000e+00> : vector<1x96xf32>
    %13 = tpu.matmul %11, %12, %cst_12 {dimension_numbers = #tpu.dot_dimension_numbers<[1], [0], [0], [1], [0, 0, 1, 1], [], []>} : vector<1x32xbf16>, vector<32x96xbf16>, vector<1x96xf32> -> vector<1x96xf32>
    %c0_13 = arith.constant 0 : index
    %c0_14 = arith.constant 0 : index
    %14 = vector.load %arg8[%c0_13, %c0_14] : memref<1x96xf32, #tpu.memory_space<vmem>>, vector<1x96xf32>
    %15 = arith.addf %13, %14 : vector<1x96xf32>
    %16 = vector.extract_strided_slice %10 {offsets = [0, 0], sizes = [1, 32], strides = [1, 1]} : vector<1x96xf32> to vector<1x32xf32>
    %17 = vector.extract_strided_slice %15 {offsets = [0, 0], sizes = [1, 32], strides = [1, 1]} : vector<1x96xf32> to vector<1x32xf32>
    %18 = arith.addf %16, %17 : vector<1x32xf32>
    %19 = arith.negf %18 : vector<1x32xf32>
    %20 = math.exp %19 : vector<1x32xf32>
    %cst_15 = arith.constant 1.000000e+00 : f32
    %21 = vector.broadcast %cst_15 : f32 to vector<1x32xf32>
    %22 = arith.addf %21, %20 : vector<1x32xf32>
    %23 = arith.divf %21, %22 : vector<1x32xf32>
    %24 = vector.extract_strided_slice %10 {offsets = [0, 32], sizes = [1, 32], strides = [1, 1]} : vector<1x96xf32> to vector<1x32xf32>
    %25 = vector.extract_strided_slice %15 {offsets = [0, 32], sizes = [1, 32], strides = [1, 1]} : vector<1x96xf32> to vector<1x32xf32>
    %26 = arith.addf %24, %25 : vector<1x32xf32>
    %27 = arith.negf %26 : vector<1x32xf32>
    %28 = math.exp %27 : vector<1x32xf32>
    %cst_16 = arith.constant 1.000000e+00 : f32
    %29 = vector.broadcast %cst_16 : f32 to vector<1x32xf32>
    %30 = arith.addf %29, %28 : vector<1x32xf32>
    %31 = arith.divf %29, %30 : vector<1x32xf32>
    %32 = vector.extract_strided_slice %10 {offsets = [0, 64], sizes = [1, 32], strides = [1, 1]} : vector<1x96xf32> to vector<1x32xf32>
    %33 = vector.extract_strided_slice %15 {offsets = [0, 64], sizes = [1, 32], strides = [1, 1]} : vector<1x96xf32> to vector<1x32xf32>
    %34 = arith.mulf %23, %33 : vector<1x32xf32>
    %35 = arith.addf %32, %34 : vector<1x32xf32>
    %36 = math.tanh %35 : vector<1x32xf32>
    %cst_17 = arith.constant 1.000000e+00 : f32
    %37 = vector.broadcast %cst_17 : f32 to vector<1x32xf32>
    %38 = arith.subf %37, %31 : vector<1x32xf32>
    %39 = arith.mulf %38, %36 : vector<1x32xf32>
    %40 = arith.mulf %31, %4 : vector<1x32xf32>
    %41 = arith.addf %39, %40 : vector<1x32xf32>
    %42 = arith.truncf %41 : vector<1x32xf32> to vector<1x32xbf16>
    %c0_18 = arith.constant 0 : index
    %c0_19 = arith.constant 0 : index
    %43 = vector.load %arg11[%c0_18, %c0_19] : memref<32x17xbf16, #tpu.memory_space<vmem>>, vector<32x17xbf16>
    %cst_20 = arith.constant dense<0.000000e+00> : vector<1x17xf32>
    %44 = tpu.matmul %42, %43, %cst_20 {dimension_numbers = #tpu.dot_dimension_numbers<[1], [0], [0], [1], [0, 0, 1, 1], [], []>} : vector<1x32xbf16>, vector<32x17xbf16>, vector<1x17xf32> -> vector<1x17xf32>
    %c0_21 = arith.constant 0 : index
    %c0_22 = arith.constant 0 : index
    %45 = vector.load %arg12[%c0_21, %c0_22] : memref<1x17xf32, #tpu.memory_space<vmem>>, vector<1x17xf32>
    %46 = arith.addf %44, %45 : vector<1x17xf32>
    %47 = tpu.iota {dimensions = array<i32: 0>} : vector<17x17xi32>
    %48 = tpu.iota {dimensions = array<i32: 1>} : vector<17x17xi32>
    %49 = arith.cmpi eq, %47, %48 : vector<17x17xi32>
    %50 = arith.extui %49 : vector<17x17xi1> to vector<17x17xi32>
    %51 = arith.sitofp %50 : vector<17x17xi32> to vector<17x17xf32>
    %52 = vector.broadcast %46 : vector<1x17xf32> to vector<17x17xf32>
    %53 = arith.mulf %51, %52 : vector<17x17xf32>
    %cst_23 = arith.constant dense<0.000000e+00> : vector<17xf32>
    %54 = vector.multi_reduction <add>, %53, %cst_23 [1] : vector<17x17xf32> to vector<17xf32>
    %55 = vector.shape_cast %54 : vector<17xf32> to vector<17x1xf32>
    %c0_24 = arith.constant 0 : index
    %c0_25 = arith.constant 0 : index
    %56 = vector.load %arg9[%c0_24, %c0_25] : memref<17x8xf32, #tpu.memory_space<vmem>>, vector<17x8xf32>
    %c0_26 = arith.constant 0 : index
    %c0_27 = arith.constant 0 : index
    %57 = vector.load %arg10[%c0_26, %c0_27] : memref<17x1xf32, #tpu.memory_space<vmem>>, vector<17x1xf32>
    %58 = vector.broadcast %57 : vector<17x1xf32> to vector<17x8xf32>
    %59 = vector.broadcast %5 : vector<1x8xf32> to vector<17x8xf32>
    %60 = arith.mulf %58, %59 : vector<17x8xf32>
    %61 = arith.addf %56, %60 : vector<17x8xf32>
    %62 = vector.broadcast %55 : vector<17x1xf32> to vector<17x8xf32>
    %63 = arith.addf %61, %62 : vector<17x8xf32>
    %c0_28 = arith.constant 0 : index
    %c0_29 = arith.constant 0 : index
    %64 = vector.load %arg13[%c0_28, %c0_29] : memref<1x17xf32, #tpu.memory_space<vmem>>, vector<1x17xf32>
    %65 = math.tanh %63 : vector<17x8xf32>
    %cst_30 = arith.constant dense<0.000000e+00> : vector<1x8xf32>
    %66 = tpu.matmul %64, %65, %cst_30 {dimension_numbers = #tpu.dot_dimension_numbers<[1], [0], [0], [1], [0, 0, 1, 1], [], []>} : vector<1x17xf32>, vector<17x8xf32>, vector<1x8xf32> -> vector<1x8xf32>
    %cst_31 = arith.constant dense<0xFF800000> : vector<1xf32>
    %67 = vector.multi_reduction <maximumf>, %66, %cst_31 [1] : vector<1x8xf32> to vector<1xf32>
    %68 = vector.shape_cast %67 : vector<1xf32> to vector<1x1xf32>
    %69 = vector.broadcast %68 : vector<1x1xf32> to vector<1x8xf32>
    %70 = arith.subf %66, %69 : vector<1x8xf32>
    %71 = math.exp %70 : vector<1x8xf32>
    %cst_32 = arith.constant dense<0.000000e+00> : vector<1xf32>
    %72 = vector.multi_reduction <add>, %71, %cst_32 [1] : vector<1x8xf32> to vector<1xf32>
    %73 = vector.shape_cast %72 : vector<1xf32> to vector<1x1xf32>
    %74 = tpu.reciprocal %73 {approx = true} : vector<1x1xf32> -> vector<1x1xf32>
    %75 = vector.broadcast %74 : vector<1x1xf32> to vector<1x8xf32>
    %76 = arith.mulf %71, %75 : vector<1x8xf32>
    %77 = arith.truncf %76 : vector<1x8xf32> to vector<1x8xbf16>
    %c0_33 = arith.constant 0 : index
    %c0_34 = arith.constant 0 : index
    %78 = vector.load %arg3[%c0_33, %c0_34] : memref<8x16xbf16, #tpu.memory_space<vmem>>, vector<8x16xbf16>
    %cst_35 = arith.constant dense<0.000000e+00> : vector<1x16xf32>
    %79 = tpu.matmul %77, %78, %cst_35 {dimension_numbers = #tpu.dot_dimension_numbers<[1], [0], [0], [1], [0, 0, 1, 1], [], []>} : vector<1x8xbf16>, vector<8x16xbf16>, vector<1x16xf32> -> vector<1x16xf32>
    %80 = arith.truncf %41 : vector<1x32xf32> to vector<1x32xbf16>
    %c0_36 = arith.constant 0 : index
    %c0_37 = arith.constant 0 : index
    %81 = vector.load %arg14[%c0_36, %c0_37] : memref<32x64xbf16, #tpu.memory_space<vmem>>, vector<32x64xbf16>
    %cst_38 = arith.constant dense<0.000000e+00> : vector<1x64xf32>
    %82 = tpu.matmul %80, %81, %cst_38 {dimension_numbers = #tpu.dot_dimension_numbers<[1], [0], [0], [1], [0, 0, 1, 1], [], []>} : vector<1x32xbf16>, vector<32x64xbf16>, vector<1x64xf32> -> vector<1x64xf32>
    %83 = arith.truncf %79 : vector<1x16xf32> to vector<1x16xbf16>
    %c0_39 = arith.constant 0 : index
    %c0_40 = arith.constant 0 : index
    %84 = vector.load %arg15[%c0_39, %c0_40] : memref<16x64xbf16, #tpu.memory_space<vmem>>, vector<16x64xbf16>
    %cst_41 = arith.constant dense<0.000000e+00> : vector<1x64xf32>
    %85 = tpu.matmul %83, %84, %cst_41 {dimension_numbers = #tpu.dot_dimension_numbers<[1], [0], [0], [1], [0, 0, 1, 1], [], []>} : vector<1x16xbf16>, vector<16x64xbf16>, vector<1x64xf32> -> vector<1x64xf32>
    %86 = arith.addf %82, %85 : vector<1x64xf32>
    %c0_42 = arith.constant 0 : index
    %c0_43 = arith.constant 0 : index
    %87 = vector.load %arg16[%c0_42, %c0_43] : memref<1x64xf32, #tpu.memory_space<vmem>>, vector<1x64xf32>
    %88 = arith.addf %86, %87 : vector<1x64xf32>
    %89 = tpu.iota {dimensions = array<i32: 1>} : vector<1x64xi32>
    %cst_44 = arith.constant dense<0xFF800000> : vector<1xf32>
    %90 = vector.multi_reduction <maximumf>, %88, %cst_44 [1] : vector<1x64xf32> to vector<1xf32>
    %91 = vector.shape_cast %90 : vector<1xf32> to vector<1x1xf32>
    %92 = vector.broadcast %91 : vector<1x1xf32> to vector<1x64xf32>
    %93 = arith.cmpf oeq, %88, %92 : vector<1x64xf32>
    %c64_i32 = arith.constant 64 : i32
    %94 = vector.broadcast %c64_i32 : i32 to vector<1x64xi32>
    %95 = arith.select %93, %89, %94 : vector<1x64xi1>, vector<1x64xi32>
    %cst_45 = arith.constant dense<2147483647> : vector<1xi32>
    %96 = vector.multi_reduction <minsi>, %95, %cst_45 [1] : vector<1x64xi32> to vector<1xi32>
    %97 = vector.shape_cast %96 : vector<1xi32> to vector<1x1xi32>
    %98 = vector.broadcast %97 : vector<1x1xi32> to vector<1x64xi32>
    %99 = arith.cmpi eq, %89, %98 : vector<1x64xi32>
    %cst_46 = arith.constant 1.000000e+00 : f32
    %cst_47 = arith.constant 0.000000e+00 : f32
    %100 = vector.broadcast %cst_46 : f32 to vector<1x64xf32>
    %101 = vector.broadcast %cst_47 : f32 to vector<1x64xf32>
    %102 = arith.select %99, %100, %101 : vector<1x64xi1>, vector<1x64xf32>
    %103 = arith.truncf %102 : vector<1x64xf32> to vector<1x64xbf16>
    %c0_48 = arith.constant 0 : index
    %c0_49 = arith.constant 0 : index
    %104 = vector.load %arg4[%c0_48, %c0_49] : memref<64x32xbf16, #tpu.memory_space<vmem>>, vector<64x32xbf16>
    %cst_50 = arith.constant dense<0.000000e+00> : vector<1x32xf32>
    %105 = tpu.matmul %103, %104, %cst_50 {dimension_numbers = #tpu.dot_dimension_numbers<[1], [0], [0], [1], [0, 0, 1, 1], [], []>} : vector<1x64xbf16>, vector<64x32xbf16>, vector<1x32xf32> -> vector<1x32xf32>
    %c0_51 = arith.constant 0 : index
    %c0_52 = arith.constant 0 : index
    %c0_53 = arith.constant 0 : index
    %106 = vector.load %arg17[%c0_51, %c0_52, %c0_53] : memref<1x1x1xi32, #tpu.memory_space<vmem>>, vector<1x1x1xi32>
    %107 = vector.shape_cast %106 : vector<1x1x1xi32> to vector<1x1xi32>
    %108 = vector.shape_cast %97 : vector<1x1xi32> to vector<1x1x1xi32>
    tpu.vector_store %arg17[%c0_51, %c0_52, %c0_53], %108 {strides = array<i32>} : memref<1x1x1xi32, #tpu.memory_space<vmem>>, vector<1x1x1xi32>,
    %c0_54 = arith.constant 0 : index
    %c0_55 = arith.constant 0 : index
    %c0_56 = arith.constant 0 : index
    %109 = vector.load %arg18[%c0_54, %c0_55, %c0_56] : memref<1x1x8xf32, #tpu.memory_space<vmem>>, vector<1x1x8xf32>
    %110 = vector.shape_cast %109 : vector<1x1x8xf32> to vector<1x8xf32>
    %111 = vector.shape_cast %76 : vector<1x8xf32> to vector<1x1x8xf32>
    tpu.vector_store %arg18[%c0_54, %c0_55, %c0_56], %111 {strides = array<i32>} : memref<1x1x8xf32, #tpu.memory_space<vmem>>, vector<1x1x8xf32>,
    %c0_57 = arith.constant 0 : index
    %c0_58 = arith.constant 0 : index
    %112 = vector.load %arg19[%c0_57, %c0_58] : memref<1x32xf32, #tpu.memory_space<vmem>>, vector<1x32xf32>
    tpu.vector_store %arg19[%c0_57, %c0_58], %105 {strides = array<i32>} : memref<1x32xf32, #tpu.memory_space<vmem>>, vector<1x32xf32>,
    %c0_59 = arith.constant 0 : index
    %c0_60 = arith.constant 0 : index
    %113 = vector.load %arg20[%c0_59, %c0_60] : memref<1x32xf32, #tpu.memory_space<vmem>>, vector<1x32xf32>
    tpu.vector_store %arg20[%c0_59, %c0_60], %41 {strides = array<i32>} : memref<1x32xf32, #tpu.memory_space<vmem>>, vector<1x32xf32>,
    %114 = arith.addf %5, %76 : vector<1x8xf32>
    %c0_61 = arith.constant 0 : index
    %c0_62 = arith.constant 0 : index
    %115 = vector.load %arg21[%c0_61, %c0_62] : memref<1x8xf32, #tpu.memory_space<vmem>>, vector<1x8xf32>
    tpu.vector_store %arg21[%c0_61, %c0_62], %114 {strides = array<i32>} : memref<1x8xf32, #tpu.memory_space<vmem>>, vector<1x8xf32>,
    return
  }
  func.func @transform_0(%arg0: i32) -> (i32, i32) {
    %c0_i32 = arith.constant 0 : i32
    %c0_i32_0 = arith.constant 0 : i32
    %c0_i32_1 = arith.constant 0 : i32
    return %c0_i32, %c0_i32_0 : i32, i32
  }
  func.func @transform_1(%arg0: i32) -> (i32, i32) {
    %c0_i32 = arith.constant 0 : i32
    %c0_i32_0 = arith.constant 0 : i32
    %c0_i32_1 = arith.constant 0 : i32
    return %c0_i32, %c0_i32_0 : i32, i32
  }
  func.func @transform_2(%arg0: i32) -> (i32, i32) {
    %c0_i32 = arith.constant 0 : i32
    %c0_i32_0 = arith.constant 0 : i32
    %c0_i32_1 = arith.constant 0 : i32
    return %c0_i32, %c0_i32_0 : i32, i32
  }
  func.func @transform_3(%arg0: i32) -> (i32, i32) {
    %c0_i32 = arith.constant 0 : i32
    %c0_i32_0 = arith.constant 0 : i32
    %c0_i32_1 = arith.constant 0 : i32
    return %c0_i32, %c0_i32_0 : i32, i32
  }
  func.func @transform_4(%arg0: i32) -> (i32, i32) {
    %c0_i32 = arith.constant 0 : i32
    %c0_i32_0 = arith.constant 0 : i32
    %c0_i32_1 = arith.constant 0 : i32
    return %c0_i32, %c0_i32_0 : i32, i32
  }
  func.func @transform_5(%arg0: i32) -> (i32, i32) {
    %c0_i32 = arith.constant 0 : i32
    %c0_i32_0 = arith.constant 0 : i32
    %c0_i32_1 = arith.constant 0 : i32
    return %c0_i32, %c0_i32_0 : i32, i32
  }
  func.func @transform_6(%arg0: i32) -> (i32, i32) {
    %c0_i32 = arith.constant 0 : i32
    %c0_i32_0 = arith.constant 0 : i32
    %c0_i32_1 = arith.constant 0 : i32
    return %c0_i32, %c0_i32_0 : i32, i32
  }
  func.func @transform_7(%arg0: i32) -> (i32, i32) {
    %c0_i32 = arith.constant 0 : i32
    %c0_i32_0 = arith.constant 0 : i32
    %c0_i32_1 = arith.constant 0 : i32
    return %c0_i32, %c0_i32_0 : i32, i32
  }
  func.func @transform_8(%arg0: i32) -> (i32, i32) {
    %c0_i32 = arith.constant 0 : i32
    %c0_i32_0 = arith.constant 0 : i32
    %c0_i32_1 = arith.constant 0 : i32
    return %c0_i32, %c0_i32_0 : i32, i32
  }
  func.func @transform_9(%arg0: i32) -> (i32, i32) {
    %c0_i32 = arith.constant 0 : i32
    %c0_i32_0 = arith.constant 0 : i32
    %c0_i32_1 = arith.constant 0 : i32
    return %c0_i32, %c0_i32_0 : i32, i32
  }
  func.func @transform_10(%arg0: i32) -> (i32, i32) {
    %c0_i32 = arith.constant 0 : i32
    %c0_i32_0 = arith.constant 0 : i32
    %c0_i32_1 = arith.constant 0 : i32
    return %c0_i32, %c0_i32_0 : i32, i32
  }
  func.func @transform_11(%arg0: i32) -> (i32, i32) {
    %c0_i32 = arith.constant 0 : i32
    %c0_i32_0 = arith.constant 0 : i32
    %c0_i32_1 = arith.constant 0 : i32
    return %c0_i32, %c0_i32_0 : i32, i32
  }
  func.func @transform_12(%arg0: i32) -> (i32, i32) {
    %c0_i32 = arith.constant 0 : i32
    %c0_i32_0 = arith.constant 0 : i32
    %c0_i32_1 = arith.constant 0 : i32
    return %c0_i32, %c0_i32_0 : i32, i32
  }
  func.func @transform_13(%arg0: i32) -> (i32, i32) {
    %c0_i32 = arith.constant 0 : i32
    %c0_i32_0 = arith.constant 0 : i32
    %c0_i32_1 = arith.constant 0 : i32
    return %c0_i32, %c0_i32_0 : i32, i32
  }
  func.func @transform_14(%arg0: i32) -> (i32, i32) {
    %c0_i32 = arith.constant 0 : i32
    %c0_i32_0 = arith.constant 0 : i32
    %c0_i32_1 = arith.constant 0 : i32
    return %c0_i32, %c0_i32_0 : i32, i32
  }
  func.func @transform_15(%arg0: i32) -> (i32, i32) {
    %c0_i32 = arith.constant 0 : i32
    %c0_i32_0 = arith.constant 0 : i32
    %c0_i32_1 = arith.constant 0 : i32
    return %c0_i32, %c0_i32_0 : i32, i32
  }
  func.func @transform_16(%arg0: i32) -> (i32, i32, i32) {
    %c0_i32 = arith.constant 0 : i32
    %c0_i32_0 = arith.constant 0 : i32
    %c0_i32_1 = arith.constant 0 : i32
    return %arg0, %c0_i32, %c0_i32_0 : i32, i32, i32
  }
  func.func @transform_17(%arg0: i32) -> (i32, i32, i32) {
    %c0_i32 = arith.constant 0 : i32
    %c0_i32_0 = arith.constant 0 : i32
    %c0_i32_1 = arith.constant 0 : i32
    return %arg0, %c0_i32, %c0_i32_0 : i32, i32, i32
  }
}

</mosaic_0001>

<bundles_post_ra>
// kernel: fused_greedy_decode.1
= control target key start
LH: loop header
LB: loop body
LE: loop exit
PB: predicated region body
PF: predicated region fallthrough
CT: control target
= control target key end

     0   :  { %s1544_s24 = smov 0   ;;  %s1726_s0 = inlined_call_operand.vmem [shape: f32[1,32], index: 0, kind: input, shape index: {}]   ;;  %s1727_s1 = inlined_call_operand.vmem [shape: f32[1,32], index: 1, kind: input, shape index: {}]   ;;  %s1728_s2 = inlined_call_operand.vmem [shape: bf16[8,16], index: 2, kind: input, shape index: {}]   ;;  %s1729_s3 = inlined_call_operand.vmem [shape: bf16[64,32], index: 3, kind: input, shape index: {}]   ;;  %s1730_s4 = inlined_call_operand.vmem [shape: bf16[32,96], index: 4, kind: input, shape index: {}]   ;;  %s1731_s5 = inlined_call_operand.vmem [shape: bf16[32,96], index: 5, kind: input, shape index: {}]   ;;  %s1732_s6 = inlined_call_operand.vmem [shape: f32[1,96], index: 6, kind: input, shape index: {}]   ;;  %s1733_s7 = inlined_call_operand.vmem [shape: f32[1,96], index: 7, kind: input, shape index: {}]   ;;  %s1734_s8 = inlined_call_operand.vmem [shape: f32[17,8], index: 8, kind: input, shape index: {}]   ;;  %s1735_s9 = inlined_call_operand.vmem [shape: f32[17,1], index: 9, kind: input, shape index: {}]   ;;  %s1736_s10 = inlined_call_operand.vmem [shape: bf16[32,17], index: 10, kind: input, shape index: {}]   ;;  %s1737_s11 = inlined_call_operand.vmem [shape: f32[1,17], index: 11, kind: input, shape index: {}]   ;;  %s1738_s12 = inlined_call_operand.vmem [shape: f32[1,17], index: 12, kind: input, shape index: {}]   ;;  %s1739_s13 = inlined_call_operand.vmem [shape: bf16[32,64], index: 13, kind: input, shape index: {}]   ;;  %s1740_s14 = inlined_call_operand.vmem [shape: bf16[16,64], index: 14, kind: input, shape index: {}]   ;;  %s1741_s15 = inlined_call_operand.vmem [shape: f32[1,64], index: 15, kind: input, shape index: {}]   ;;  %s1742_s16 = inlined_call_operand.vmem [shape: s32[6,1,1], index: 16, kind: output, shape index: {0}]   ;;  %s1743_s17 = inlined_call_operand.vmem [shape: f32[6,1,8], index: 17, kind: output, shape index: {1}]  }
   0x1   :  { %1744 = sst [smem:[#allocation5_spill]] %s1726_s0 }
   0x2   :  { %1745 = sst [smem:[#allocation6_spill]] %s1727_s1 }
   0x3 LB: > { %s1265_s25 = sadd.s32 4294967295, %s1444_s24   ;;  %p1268_p0 = scmp.ge.s32.totalorder %s1444_s24, 1  ;;  %s1444_s24 = sphi %s1544_s24, %s28_s24  }
   0x4   : > { %p480_p1 = scmp.lt.s32.totalorder %s1444_s24, 7 }
   0x6   : > { %p481_p2 = pnand %p1268_p0, %p480_p1 }
   0x7   : > { %p528_p3 = scmp.lt.s32.totalorder (!%p481_p2), %s1265_s25, 5  ;;  %p1269_p4 = scmp.ne.s32.totalorder (!%p481_p2), %s1265_s25, 0 }
   0x8   : > { %484 = sbr.rel (%p481_p2) target bundleno = 2788 (0xae4), region = 84 }
   0xf   : > { %s1552_s26 = scalar_select %p528_p3, %s1265_s25, 5 }
  0x10   : > { %538 = sbr.rel (%p1269_p4) target bundleno = 26 (0x1a), region = 88  ;;  %s1746_s20 = sld [smem:[#allocation5_spill]] (!%p1269_p4)  ;;  %vm540_vm0 = vcmask (!%p1269_p4), 253952   ;;  %vm544_vm1 = vcmask (!%p1269_p4), 57344   ;;  %v1446_v2 = vmov (!%p1269_p4), 0.0  }
  0x11   : > { %s530_s29 = scalar_lea.vmem %s1742_s16, %s1552_s26  ;;  %s533_s18 = scalar_lea.vmem %s1743_s17, %s1552_s26  ;;  %545 = vst.msk [vmem:[#allocation4] sm:$0x1] (!%p1269_p4), %vm544_vm1, %v1446_v2 }
  0x12   : > { %s1747_s23 = sld [smem:[#allocation6_spill]] (!%p1269_p4) }
  0x16   : > { %v539_v0 = vld [vmem:[%s1746_s20] sm:$0x1] (!%p1269_p4) }
  0x17   : > { %541 = vst.msk [vmem:[#allocation2] sm:$0x1] %vm540_vm0, %v539_v0 }
  0x18   : > { %v542_v1 = vld [vmem:[%s1747_s23] sm:$0x1] }
  0x19   : > { %543 = vst.msk [vmem:[#allocation3] sm:$0x1] %vm540_vm0, %v542_v1 }
  0x1a PF: > { %v1409_v3 = vld [vmem:[%s1730_s4] sm:$0xff]   ;;  %v1447_v4 = vmov 0.0   ;;  %v1410_v5 = vld [vmem:[%s1730_s4 + $0x8] sm:$0xff]   ;;  %vm1448_vm2 = vmmov 0   ;;  %vm567_vm3 = vcmask 261120   ;;  %s1449_s23 = smov 64   ;;  %v697_v33 = vlaneseq }
  0x1b   : > { %1323 = vmatprep.subr.bf16.mxu1 %v1447_v4  ;;  %1339 = vmatprep.subr.bf16.mxu0 %v1447_v4  ;;  %v1411_v7 = vld [vmem:[%s1731_s5] sm:$0xff]   ;;  %v1412_v9 = vld [vmem:[%s1731_s5 + $0x8] sm:$0xff]   ;;  %s1450_s1 = smov 96   ;;  %s1451_s20 = smov 32   ;;  %v1452_v40 = vmov 0   ;;  %vm792_vm6 = vcmask 138240  }
  0x1c   : > { %1324 = vmatpush3.bf16.msra.mxu1 %v1409_v3  ;;  %1327 = vmatprep.mubr.msk.bf16.mxu1 %vm1448_vm2, %v1447_v4  ;;  %v616_v16 = vld [vmem:[%s1733_s7] sm:$0x1]  ;;  %v698_v34 = vshrl.u32 %v697_v33, 7  ;;  %v1414_v38 = vld [vmem:[%s1736_s10 + $0x8] sm:$0xff]   ;;  %v1627_v51 = vand.u32 127, %v697_v33  ;;  %v1453_v3 = vmov 0.0|0.0  }
  0x1d   : > { %1325 = vmatprep.subr.bf16.mxu1 %v1447_v4  ;;  %1343 = vmatprep.mubr.msk.bf16.mxu0 %vm1448_vm2, %v1447_v4  ;;  %v554_v22 = vld [vmem:[%s1732_s6] sm:$0x1]  ;;  %v807_v1 = vld [vmem:[%s1735_s9 + $0x8] sm:$0xff]  ;;  %v808_v2 = vld [vmem:[%s1735_s9 + $0x10] sm:$0x1]  ;;  %vm799_vm8 = vcmask 131072  }
  0x1e   : > { %v1601_v35 = vsub.s32 0, %v698_v34  ;;  %v1413_v36 = vld [vmem:[%s1736_s10] sm:$0xff]   ;;  %1407 = vset.pattern.permute.xlu0 %v1452_v40  ;;  %1408 = vset.pattern.permute.xlu1 %v1452_v40  ;;  %v772_v50 = vadd.s32 8, %v698_v34  ;;  %vm776_vm5 = vcmp.eq.s32.totalorder %v698_v34, %v1627_v51  ;;  %vm846_vm9 = vcmask 1040384  }
  0x1f   : > { %1340 = vmatpush3.bf16.msra.mxu0 %v1413_v36  ;;  %v806_v48 = vld [vmem:[%s1735_s9] sm:$0xff]  ;;  %v1280_v58 = vsel %vm776_vm5, 1.0, %v1447_v4  ;;  %vm920_vm10 = vcmask 57344   ;;  %vm938_vm11 = vcmask 1043456   ;;  %vm934_vm12 = vcmask 64512  }
  0x20   : > { %1326 = vmatpush3.bf16.msra.mxu1 %v1410_v5  ;;  %v547_v10 = vld [vmem:[#allocation3] sm:$0x1]  ;;  %1341 = vmatprep.subr.bf16.mxu0 %v1447_v4  ;;  %v711_v52 = vld [vmem:[%s1737_s11] sm:$0x1]  ;;  %vm777_vm4 = vcmp.eq.s32.totalorder %v772_v50, %v1627_v51  ;;  %v773_v5 = vadd.s32 16, %v698_v34  ;;  %vm995_vm13 = vcmask 130048  }
  0x21   : > { %v546_v6 = vld [vmem:[#allocation2] sm:$0x1]  ;;  %1331 = vmatprep.subr.bf16.mxu1 %v1447_v4  ;;  %v611_v11 = vpack.c.bf16 %v547_v10, %v547_v10  ;;  %v700_v39 = vrot.slane %v547_v10, %v1601_v35  ;;  %v1281_v57 = vsel %vm777_vm4, 1.0, %v1447_v4  ;;  %vm1093_vm14 = vcmask 516096  }
  0x22   : > { %v549_v8 = vpack.c.bf16 %v546_v6, %v546_v6  ;;  %vm778_vm7 = vcmp.eq.s32.totalorder %v773_v5, %v1627_v51  ;;  %v1415_v50 = vld [vmem:[%s1739_s13] sm:$0xff]   ;;  %vm1193_vm1 = vcmask 0   ;;  %vm1149_vm4 = vcmask 523264  }
  0x23   : > { %1342 = vmatpush3.bf16.msra.mxu0 %v1414_v38  ;;  %v1282_v6 = vsel %vm778_vm7, 1.0, %v1447_v4 }
  0x24   : > { %1328 = vmatmul.mubr.msk.bf16.vlgmr.msra.gmra.mrb[0].mxu1 %vm567_vm3, %v549_v8  ;;  %1362 = vmatprep.subr.bf16.mxu0 %v1447_v4 }
  0x25   : > { %1332 = vmatpush3.bf16.msra.mxu1 %v1411_v7  ;;  %1335 = vmatprep.mubr.msk.bf16.mxu1 %vm1448_vm2, %v1447_v4 }
  0x26   : > { %1333 = vmatprep.subr.bf16.mxu1 %v1447_v4 }
  0x29   : > { %1334 = vmatpush3.bf16.msra.mxu1 %v1412_v9  ;;  %v548_v9 = vld [vmem:[#allocation4] sm:$0x1] }
  0x2a   : > { %1388 = vmatprep.subr.bf16.mxu1 %v1453_v3  ;;  %v828_v10 = vrot.slane %v548_v9, %v1601_v35 }
  0x2c   : > { %1336 = vmatmul.mubr.msk.bf16.vlgmr.msra.gmra.mrb[4].mxu1 %vm567_vm3, %v611_v11 }
  0x2d   : > { %1353 = vmatprep.mubr.msk.f32.mxu1 %vm1448_vm2, %v1447_v4 }
  0xf7   : > { %v605_v12 = vpop.f32.mrb[0].mxu1 }
  0xf8   : > { %v1329_v13 = vpop.f32.mrb[1].mxu1  ;;  %v606_v23 = vadd.f32 %v605_v12, %v554_v22 }
  0xf9   : > { %v608_v14 = vpop.f32.mrb[2].mxu1  ;;  %v803_v13 = vld [vmem:[%s1734_s8] sm:$0xff] }
  0xfa   : > { %v1330_v15 = vpop.f32.mrb[3].mxu1 }
  0xff   : > { %v666_v17 = vpop.f32.mrb[4].mxu1 }
 0x100   : > { %v667_v18 = vadd.f32 %v666_v17, %v616_v16  ;;  %v1337_v19 = vpop.f32.mrb[5].mxu1  ;;  %v804_v16 = vld [vmem:[%s1734_s8 + $0x8] sm:$0xff] }
 0x101   : > { %v669_v20 = vpop.f32.mrb[6].mxu1 }
 0x102   : > { %680 = vrot.lane.b32.xlu0 %v667_v18, %s1449_s23  ;;  %v1338_v21 = vpop.f32.mrb[7].mxu1  ;;  %v672_v24 = vadd.f32 %v667_v18, %v606_v23 }
 0x104   : > { %v1276_v25 = vmul.f32 -1.442695, %v672_v24 }
 0x106   : > { %1422 = vpow2.f32 %v1276_v25 }
 0x110   : > { %v1423_v26 = vpop.eup %1422 }
 0x111   : > { %v676_v27 = vadd.f32 1.0, %v1423_v26 }
 0x113   : > { %1424 = vrcp.f32 %v676_v27 }
 0x11d   : > { %v1425_v28 = vpop.eup %1424 }
 0x11e   : > { %v690_v42 = vsub.f32 1.0, %v1425_v28 }
 0x174   : > { %v681_v29 = vpop.permute.xlu0 %680 }
 0x175   : > { %v683_v30 = vmul.f32 %v1425_v28, %v681_v29 }
 0x177   : > { %685 = vrot.lane.b32.xlu0 %v683_v30, %s1449_s23 }
 0x1e9   : > { %v686_v31 = vpop.permute.xlu0 %685 }
 0x1ea   : > { %v688_v32 = vadd.f32 %v686_v31, %v606_v23 }
 0x1ec   : > { %1426 = vtanh.f32 %v688_v32  ;;  %v839_v32 = vld [vmem:[%s1738_s12] sm:$0x1] }
 0x1f6   : > { %v1427_v37 = vpop.eup %1426 }
 0x1f7   : > { %692 = vrot.lane.b32.xlu1 %v1427_v37, %s1450_s1 }
 0x1fb   : > { %701 = vrot.lane.b32.xlu1 %v700_v39, %s1451_s20 }
 0x269   : > { %v693_v41 = vpop.permute.xlu1 %692 }
 0x26a   : > { %v695_v44 = vmul.f32 %v693_v41, %v690_v42  ;;  %v933_v42 = vld [vmem:[%s1728_s2] sm:$0xf] }
 0x26d   : > { %v702_v43 = vpop.permute.xlu1 %701 }
 0x26e   : > { %v704_v45 = vmul.f32 %v1425_v28, %v702_v43  ;;  %v805_v28 = vld [vmem:[%s1734_s8 + $0x10] sm:$0x1]  ;;  %v940_v43 = vsel %vm938_vm11, %v933_v42, 0 }
 0x270   : > { %v1613_v46 = vadd.f32 %v704_v45, %v695_v44  ;;  %v1417_v44 = vld [vmem:[%s1740_s14] sm:$0xff]  }
 0x272   : > { %v706_v47 = vpack.c.bf16 %v1613_v46, %v1613_v46 }
 0x274   : > { %713 = vrot.lane.b32.xlu0 %v706_v47, %s1450_s1 }
 0x278   : > { %811 = vperm.xlu0 %1407, %v806_v48  }
 0x2e6   : > { %v1621_v49 = vpop.permute.xlu0 %713 }
 0x2e7   : > { %1344 = vmatmul.mubr.msk.bf16.vlgmr.msra.gmra.mrb[0].mxu0 %vm567_vm3, %v1621_v49 }
 0x2e8   : > { %1364 = vmatprep.mubr.msk.bf16.mxu0 %vm1448_vm2, %v1447_v4  ;;  %1363 = vmatpush3.bf16.msra.mxu0 %v1417_v44 }
 0x2e9   : > { %1376 = vmatprep.subr.bf16.mxu0 %v1447_v4 }
 0x2f7   : > { %v812_v11 = vpop.permute.xlu0 %811 }
 0x2f8   : > { %v830_v12 = vmul.f32 %v828_v10, %v812_v11 }
 0x2fa   : > { %v833_v15 = vadd.f32 %v830_v12, %v803_v13  ;;  %v1418_v13 = vld [vmem:[%s1729_s3] sm:$0xff]  }
 0x3ba   : > { %v764_v53 = vpop.f32.mrb[0].mxu0 }
 0x3bb   : > { %v765_v54 = vadd.f32 %v764_v53, %v711_v52  ;;  %v1345_v55 = vpop.f32.mrb[1].mxu0 }
 0x3bc   : > { %v767_v56 = vpop.f32.mrb[2].mxu0 }
 0x3bd   : > { %v788_v59 = vrot.slane %v765_v54, %v1601_v35  ;;  %v1346_v60 = vpop.f32.mrb[3].mxu0  ;;  %v1416_v54 = vld [vmem:[%s1739_s13 + $0x8] sm:$0xff]  }
 0x3bf   : > { %v790_v61 = vmul.f32 %v1281_v57, %v788_v59  ;;  %v789_v62 = vmul.f32 %v1280_v58, %v788_v59  ;;  %v791_v7 = vmul.f32 %v1282_v6, %v788_v59 }
 0x3c1   : > { %v796_v63 = vsel %vm792_vm6, %v790_v61, 0.0  ;;  %v793_v0 = vsel %vm792_vm6, %v789_v62, 0.0  ;;  %v800_v8 = vsel %vm799_vm8, %v791_v7, 0.0 }
 0x3c2   : > { %797 = vadd.xlane.f32.xlu0 %v796_v63  ;;  %794 = vadd.xlane.f32.xlu1 %v793_v0 }
 0x3d3   : > { %816 = vperm.xlu1 %1408, %v807_v1   ;;  %v1091_v1 = vld [vmem:[%s1741_s15] sm:$0x1] }
 0x3d8   : > { %821 = vperm.xlu0 %1407, %v808_v2  }
 0x3f7   : > { %801 = vadd.xlane.f32.xlu1 %v800_v8 }
 0x44f   : > { %v795_v14 = vpop.xlane.xlu1 %794  ;;  %v798_v21 = vpop.xlane.xlu0 %797 }
 0x450   : > { %v836_v19 = vadd.f32 %v833_v15, %v795_v14  ;;  %v1419_v14 = vld [vmem:[%s1729_s3 + $0x8] sm:$0xff]  }
 0x452   : > { %1428 = vtanh.f32 %v836_v19  ;;  %v1420_v19 = vld [vmem:[%s1729_s3 + $0x10] sm:$0xff]  }
 0x453   : > { %v817_v17 = vpop.permute.xlu1 %816 }
 0x454   : > { %v831_v18 = vmul.f32 %v828_v10, %v817_v17 }
 0x456   : > { %v834_v20 = vadd.f32 %v831_v18, %v804_v16 }
 0x457   : > { %v822_v26 = vpop.permute.xlu0 %821 }
 0x458   : > { %v837_v22 = vadd.f32 %v834_v20, %v798_v21  ;;  %v832_v27 = vmul.f32 %v828_v10, %v822_v26  ;;  %v1421_v20 = vld [vmem:[%s1729_s3 + $0x18] sm:$0xff]  }
 0x45a   : > { %1430 = vtanh.f32 %v837_v22  ;;  %v835_v29 = vadd.f32 %v832_v27, %v805_v28 }
 0x45c   : > { %v1429_v23 = vpop.eup %1428 }
 0x464   : > { %v1431_v24 = vpop.eup %1430 }
 0x465   : > { %v1389_v25 = vpack.c.bf16 %v1431_v24, %v1429_v23 }
 0x467   : > { %1390 = vmatpush3.bf16.msra.mxu1 %v1389_v25 }
 0x468   : > { %1351 = vmatprep.subr.mxu1 %v1447_v4 }
 0x484   : > { %v802_v30 = vpop.xlane.xlu1 %801 }
 0x485   : > { %v838_v31 = vadd.f32 %v835_v29, %v802_v30 }
 0x487   : > { %1432 = vtanh.f32 %v838_v31 }
 0x491   : > { %v1433_v33 = vpop.eup %1432 }
 0x492   : > { %1352 = vmatpush3.msk.msra.mxu1 %vm846_vm9, %v1433_v33 }
 0x493   : > { %1354 = vmatmul.mubr.msk.f32.vlgmr.msra.gmra.mrb[8].mxu1 %vm792_vm6, %v839_v32  ;;  %1356 = vmatprep.subr.bf16.mxu1 %v1447_v4 }
 0x494   : > { %1358 = vmatprep.mubr.msk.bf16.mxu1 %vm1448_vm2, %v1447_v4  ;;  %1357 = vmatpush3.bf16.msra.mxu1 %v940_v43 }
 0x495   : > { %1368 = vmatprep.subr.bf16.mxu1 %v1447_v4 }
 0x566   : > { %v916_v34 = vpop.f32.mrb[8].mxu1 }
 0x567   : > { %v921_v35 = vsel %vm920_vm10, %v916_v34, -inf  ;;  %v1355_v36 = vpop.f32.mrb[9].mxu1 }
 0x568   : > { %922 = vmax.xlane.f32.xlu0 %v921_v35 }
 0x5f5   : > { %v923_v37 = vpop.xlane.xlu0 %922 }
 0x5f6   : > { %v924_v38 = vsub.f32 %v916_v34, %v923_v37 }
 0x5f8   : > { %v925_v39 = vmul.f32 1.442695, %v924_v38 }
 0x5fa   : > { %1434 = vpow2.f32 %v925_v39 }
 0x604   : > { %v1435_v40 = vpop.eup %1434 }
 0x605   : > { %v927_v41 = vsel %vm920_vm10, %v1435_v40, 0.0 }
 0x606   : > { %928 = vadd.xlane.f32.xlu1 %v927_v41 }
 0x693   : > { %v929_v45 = vpop.xlane.xlu1 %928 }
 0x694   : > { %1436 = vrcp.f32 %v929_v45 }
 0x69e   : > { %v1437_v47 = vpop.eup %1436 }
 0x69f   : > { %v931_v48 = vmul.f32 %v1437_v47, %v1435_v40 }
 0x6a1   : > { %1195 = vst.msk [vmem:[%s533_s18] sm:$0x1] %vm920_vm10, %v931_v48  ;;  %v1203_v52 = vadd.f32 %v931_v48, %v548_v9  ;;  %v932_v53 = vpack.c.bf16 %v931_v48, %v931_v48 }
 0x6a3   : > { %1204 = vst.msk [vmem:[#allocation4] sm:$0x1] %vm920_vm10, %v1203_v52  ;;  %1359 = vmatmul.mubr.msk.bf16.vlgmr.msra.gmra.mrb[12].mxu1 %vm934_vm12, %v932_v53 }
 0x6a4   : > { %1369 = vmatpush3.bf16.msra.mxu1 %v1415_v50  ;;  %1372 = vmatprep.mubr.msk.bf16.mxu1 %vm1448_vm2, %v1447_v4 }
 0x6a5   : > { %1370 = vmatprep.subr.bf16.mxu1 %v1447_v4 }
 0x6a8   : > { %1371 = vmatpush3.bf16.msra.mxu1 %v1416_v54 }
 0x6ab   : > { %1373 = vmatmul.mubr.msk.bf16.vlgmr.msra.gmra.mrb[16].mxu1 %vm567_vm3, %v1621_v49 }
 0x776   : > { %v976_v55 = vpop.f32.mrb[12].mxu1 }
 0x777   : > { %v986_v56 = vpack.c.bf16 %v976_v55, %v976_v55  ;;  %v1360_v57 = vpop.f32.mrb[13].mxu1 }
 0x778   : > { %v979_v58 = vpop.f32.mrb[14].mxu1 }
 0x779   : > { %v1361_v59 = vpop.f32.mrb[15].mxu1  ;;  %1365 = vmatmul.mubr.msk.bf16.vlgmr.msra.gmra.mrb[4].mxu0 %vm995_vm13, %v986_v56 }
 0x77a   : > { %1384 = vmatprep.mubr.msk.bf16.mxu0 %vm1448_vm2, %v1447_v4  ;;  %1377 = vmatpush3.bf16.msra.mxu0 %v1418_v13  ;;  %vm1196_vm2 = vcmask 253952  }
 0x77b   : > { %1378 = vmatprep.subr.bf16.mxu0 %v1447_v4 }
 0x77e   : > { %v1085_v60 = vpop.f32.mrb[16].mxu1  ;;  %1379 = vmatpush3.bf16.msra.mxu0 %v1419_v14 }
 0x77f   : > { %v1374_v61 = vpop.f32.mrb[17].mxu1  ;;  %1380 = vmatprep.subr.bf16.mxu0 %v1447_v4 }
 0x780   : > { %v1088_v62 = vpop.f32.mrb[18].mxu1 }
 0x781   : > { %v1375_v63 = vpop.f32.mrb[19].mxu1 }
 0x782   : > { %1381 = vmatpush3.bf16.msra.mxu0 %v1420_v19 }
 0x783   : > { %1382 = vmatprep.subr.bf16.mxu0 %v1447_v4 }
 0x786   : > { %1383 = vmatpush3.bf16.msra.mxu0 %v1421_v20 }
 0x84c   : > { %v1033_v0 = vpop.f32.mrb[4].mxu0 }
 0x84d   : > { %v1086_v49 = vadd.f32 %v1085_v60, %v1033_v0  ;;  %v1366_v2 = vpop.f32.mrb[5].mxu0 }
 0x84e   : > { %v1036_v3 = vpop.f32.mrb[6].mxu0 }
 0x84f   : > { %v1367_v5 = vpop.f32.mrb[7].mxu0  ;;  %v1092_v6 = vadd.f32 %v1091_v1, %v1086_v49 }
 0x851   : > { %v1094_v7 = vsel %vm1093_vm14, %v1092_v6, -inf }
 0x852   : > { %1095 = vmax.xlane.f32.xlu1 %v1094_v7 }
 0x8df   : > { %v1096_v8 = vpop.xlane.xlu1 %1095 }
 0x8e0   : > { %vm1097_vm15 = vcmp.eq.f32.partialorder %v1092_v6, %v1096_v8 }
 0x8e1   : > { %v1098_v9 = vsel %vm1097_vm15, %v1627_v51, 64 }
 0x8e2   : > { %v1099_v10 = vsel %vm1093_vm14, %v1098_v9, 2147483647 }
 0x8e3   : > { %v1101_v11 = vshra.s32 %v1099_v10, 16  ;;  %v1100_v15 = vand.u32 65535, %v1099_v10 }
 0x8e5   : > { %v1103_v12 = vcvt.s32.f32 %v1101_v11  ;;  %v1102_v17 = vcvt.s32.f32 %v1100_v15 }
 0x8e7   : > { %1104 = vmin.xlane.f32.xlu1 %v1103_v12 }
 0x974   : > { %v1105_v16 = vpop.xlane.xlu1 %1104 }
 0x975   : > { %vm1106_vm0 = vcmp.eq.f32.partialorder %v1103_v12, %v1105_v16  ;;  %v1111_v21 = vcvt.f32.s32 %v1105_v16 }
 0x976   : > { %v1107_v18 = vsel %vm1106_vm0, %v1102_v17, inf }
 0x977   : > { %1108 = vmin.xlane.f32.xlu1 %v1107_v18  ;;  %v1112_v23 = vshll.u32 %v1111_v21, 16 }
 0x988   : > { %1199 = vrot.lane.b32.xlu1 %v1613_v46, %s1450_s1 }
 0xa04   : > { %v1109_v22 = vpop.xlane.xlu1 %1108 }
 0xa05   : > { %v1110_v24 = vcvt.f32.s32 %v1109_v22 }
 0xa07   : > { %v1113_v25 = vadd.s32 %v1112_v23, %v1110_v24 }
 0xa08   : > { %v1200_v26 = vpop.permute.xlu1 %1199 }
 0xa09   : > { %vm1114_vm3 = vcmp.eq.s32.totalorder %v1627_v51, %v1113_v25  ;;  %1194 = vst.msk [vmem:[%s530_s29] sm:$0x1] %vm1193_vm1, %v1113_v25 }
 0xa0a   : > { %1202 = vst.msk [vmem:[#allocation3] sm:$0x1] %vm1196_vm2, %v1200_v26  ;;  %v1115_v46 = vsel %vm1114_vm3, 1.0, %v1447_v4 }
 0xa0b   : > { %v1116_v27 = vpack.c.bf16 %v1115_v46, %v1115_v46 }
 0xa0d   : > { %1385 = vmatmul.mubr.msk.bf16.vlgmr.msra.gmra.mrb[8].mxu0 %vm1149_vm4, %v1116_v27 }
 0xae0   : > { %v1187_v28 = vpop.f32.mrb[8].mxu0 }
 0xae1   : > { %1197 = vst.msk [vmem:[#allocation2] sm:$0x1] %vm1196_vm2, %v1187_v28  ;;  %v1386_v29 = vpop.f32.mrb[9].mxu0 }
 0xae2   : > { %v1190_v30 = vpop.f32.mrb[10].mxu0 }
 0xae3   : > { %v1387_v31 = vpop.f32.mrb[11].mxu0 }
 0xae4 PF: > { %s28_s24 = sadd.s32 1, %s1444_s24  }
 0xae5   : > { %p25_p5 = scmp.ge.s32.totalorder %s28_s24, 8  }
 0xae7   :  { %27 = sbr.rel (!%p25_p5) target bundleno = 3 (0x3), region = 127 }

</bundles_post_ra>
